<compile_context>
chip_gen: v6e
topology: v6e:2x2x1
jax: 0.10.0
libtpu: 0.0.40
codegen_flags: <defaults>
</compile_context>

<pallas_src>
import functools

import jax
import jax.numpy as jnp
from jax.experimental import pallas as pl
from jax.experimental.pallas import tpu as pltpu

EPS = 1e-5
MOMENTUM = 0.9

_MAX_C_TILE = 64          # sublane-axis tile cap (multiple of 8)
_MAX_LANE_TILE = 2048     # lane-axis tile cap (multiple of 128)
_VMEM_LIMIT = 32 * 1024 * 1024


def _pick_tile(dim, quantum, cap):
    """Largest multiple of `quantum` that divides `dim` and is <= cap,
    falling back to the full dim (always a legal block size)."""
    if dim <= cap:
        return dim
    t = (cap // quantum) * quantum
    while t >= quantum:
        if dim % t == 0:
            return t
        t -= quantum
    # TODO(synk): masked edge tiles for dims with no aligned divisor; for now
    # fall back to the full (untiled) extent.
    return dim


# --------------------------------------------------------------------------
# Kernels
# --------------------------------------------------------------------------

def _stats_kernel(x_ref, g_ref, b_ref, mm_ref, mv_ref,
                  scale_ref, shift_ref, nmm_ref, nmv_ref,
                  sum_ref, sq_ref, *, axis, inv_count, red_axes):
    """Accumulate per-channel sum / sum-of-squares across the reduction grid
    axes; on the last step emit folded scale/shift and updated moving stats."""
    is_first = pl.program_id(red_axes[0]) == 0
    is_last = pl.program_id(red_axes[0]) == pl.num_programs(red_axes[0]) - 1
    for a in red_axes[1:]:
        is_first = jnp.logical_and(is_first, pl.program_id(a) == 0)
        is_last = jnp.logical_and(
            is_last, pl.program_id(a) == pl.num_programs(a) - 1)

    @pl.when(is_first)
    def _():
        sum_ref[...] = jnp.zeros_like(sum_ref)
        sq_ref[...] = jnp.zeros_like(sq_ref)

    x = x_ref[...].astype(jnp.float32)
    sum_ref[...] += jnp.sum(x, axis=axis, keepdims=True)
    sq_ref[...] += jnp.sum(x * x, axis=axis, keepdims=True)

    @pl.when(is_last)
    def _():
        # f32 accumulators keep E[x^2] - E[x]^2 well conditioned here; switch
        # to per-tile centered / Welford sums if |mean| >> std becomes common.
        mean = sum_ref[...] * inv_count
        var = jnp.maximum(sq_ref[...] * inv_count - mean * mean, 0.0)
        inv_std = jax.lax.rsqrt(var + EPS)
        scale = g_ref[...] * inv_std
        scale_ref[...] = scale
        shift_ref[...] = b_ref[...] - mean * scale
        nmm_ref[...] = MOMENTUM * mm_ref[...] + (1.0 - MOMENTUM) * mean
        nmv_ref[...] = MOMENTUM * mv_ref[...] + (1.0 - MOMENTUM) * var


def _affine_kernel(x_ref, scale_ref, shift_ref, y_ref):
    x = x_ref[...].astype(jnp.float32)
    y_ref[...] = (x * scale_ref[...] + shift_ref[...]).astype(y_ref.dtype)


# --------------------------------------------------------------------------
# Wrappers
# --------------------------------------------------------------------------

def _batch_norm_4d(x, gamma, beta, mm, mv):
    N, C, H, W = x.shape
    HW = H * W
    x3 = x.reshape(N, C, HW)                       # free: no data movement
    g = gamma.reshape(C, 1).astype(jnp.float32)
    b = beta.reshape(C, 1).astype(jnp.float32)
    mm2 = mm.reshape(C, 1).astype(jnp.float32)
    mv2 = mv.reshape(C, 1).astype(jnp.float32)

    c_t = _pick_tile(C, 8, _MAX_C_TILE)
    hw_t = _pick_tile(HW, 128, _MAX_LANE_TILE)
    grid = (C // c_t, N, HW // hw_t)
    inv_count = 1.0 / float(N * HW)
    itemsize = x.dtype.itemsize

    x_spec = pl.BlockSpec((None, c_t, hw_t), lambda c, n, h: (n, c, h))
    col_spec = pl.BlockSpec((c_t, 1), lambda c, n, h: (c, 0))

    scale, shift, nmm, nmv = pl.pallas_call(
        functools.partial(_stats_kernel, axis=-1, inv_count=inv_count,
                          red_axes=(1, 2)),
        grid_spec=pltpu.PrefetchScalarGridSpec(
            num_scalar_prefetch=0,
            grid=grid,
            in_specs=[x_spec, col_spec, col_spec, col_spec, col_spec],
            out_specs=(col_spec, col_spec, col_spec, col_spec),
            scratch_shapes=[pltpu.VMEM((c_t, 1), jnp.float32),
                            pltpu.VMEM((c_t, 1), jnp.float32)],
        ),
        out_shape=(jax.ShapeDtypeStruct((C, 1), jnp.float32),) * 4,
        compiler_params=pltpu.CompilerParams(
            dimension_semantics=("parallel", "arbitrary", "arbitrary"),
            vmem_limit_bytes=_VMEM_LIMIT),
        cost_estimate=pl.CostEstimate(
            flops=3 * N * C * HW, transcendentals=C,
            bytes_accessed=N * C * HW * itemsize + 8 * C * 4),
    )(x3, g, b, mm2, mv2)

    y3 = pl.pallas_call(
        _affine_kernel,
        grid_spec=pltpu.PrefetchScalarGridSpec(
            num_scalar_prefetch=0,
            grid=grid,
            in_specs=[x_spec, col_spec, col_spec],
            out_specs=x_spec,
        ),
        out_shape=jax.ShapeDtypeStruct((N, C, HW), x.dtype),
        compiler_params=pltpu.CompilerParams(
            dimension_semantics=("parallel", "parallel", "parallel"),
            vmem_limit_bytes=_VMEM_LIMIT),
        cost_estimate=pl.CostEstimate(
            flops=2 * N * C * HW, transcendentals=0,
            bytes_accessed=2 * N * C * HW * itemsize + 2 * C * 4),
    )(x3, scale, shift)

    return (y3.reshape(N, C, H, W),
            nmm.reshape(1, C, 1, 1), nmv.reshape(1, C, 1, 1))


def _batch_norm_2d(x, gamma, beta, mm, mv):
    # (N, C) path: keep C on lanes (no transpose), reduce over the sublane/N axis.
    N, C = x.shape
    g = gamma.reshape(1, C).astype(jnp.float32)
    b = beta.reshape(1, C).astype(jnp.float32)
    mm2 = mm.reshape(1, C).astype(jnp.float32)
    mv2 = mv.reshape(1, C).astype(jnp.float32)

    n_t = _pick_tile(N, 8, 1024)
    grid = (N // n_t,)
    inv_count = 1.0 / float(N)
    itemsize = x.dtype.itemsize

    x_spec = pl.BlockSpec((n_t, C), lambda n: (n, 0))
    row_spec = pl.BlockSpec((1, C), lambda n: (0, 0))

    scale, shift, nmm, nmv = pl.pallas_call(
        functools.partial(_stats_kernel, axis=0, inv_count=inv_count,
                          red_axes=(0,)),
        grid_spec=pltpu.PrefetchScalarGridSpec(
            num_scalar_prefetch=0,
            grid=grid,
            in_specs=[x_spec, row_spec, row_spec, row_spec, row_spec],
            out_specs=(row_spec, row_spec, row_spec, row_spec),
            scratch_shapes=[pltpu.VMEM((1, C), jnp.float32),
                            pltpu.VMEM((1, C), jnp.float32)],
        ),
        out_shape=(jax.ShapeDtypeStruct((1, C), jnp.float32),) * 4,
        compiler_params=pltpu.CompilerParams(
            dimension_semantics=("arbitrary",),
            vmem_limit_bytes=_VMEM_LIMIT),
        cost_estimate=pl.CostEstimate(
            flops=3 * N * C, transcendentals=C,
            bytes_accessed=N * C * itemsize + 8 * C * 4),
    )(x, g, b, mm2, mv2)

    y = pl.pallas_call(
        _affine_kernel,
        grid_spec=pltpu.PrefetchScalarGridSpec(
            num_scalar_prefetch=0,
            grid=grid,
            in_specs=[x_spec, row_spec, row_spec],
            out_specs=x_spec,
        ),
        out_shape=jax.ShapeDtypeStruct((N, C), x.dtype),
        compiler_params=pltpu.CompilerParams(
            dimension_semantics=("parallel",),
            vmem_limit_bytes=_VMEM_LIMIT),
        cost_estimate=pl.CostEstimate(
            flops=2 * N * C, transcendentals=0,
            bytes_accessed=2 * N * C * itemsize + 2 * C * 4),
    )(x, scale, shift)

    return y, nmm.reshape(1, C), nmv.reshape(1, C)


def batch_norm_pallas(x, gamma, beta, moving_mean, moving_var):
    """Training-mode batch norm. Returns (Y, new_moving_mean, new_moving_var)."""
    assert x.ndim in (2, 4)
    if x.ndim == 4:
        return _batch_norm_4d(x, gamma, beta, moving_mean, moving_var)
    return _batch_norm_2d(x, gamma, beta, moving_mean, moving_var)


class BatchNorm:
    """JAX port of the PyTorch BatchNorm module (forward / training mode)."""

    def __init__(self, num_features, num_dims):
        if num_dims == 2:
            shape = (1, num_features)
        else:
            shape = (1, num_features, 1, 1)
        # deterministic init, same as the PyTorch module
        self.gamma = jnp.ones(shape, jnp.float32)
        self.beta = jnp.zeros(shape, jnp.float32)
        self.moving_mean = jnp.zeros(shape, jnp.float32)
        self.moving_var = jnp.ones(shape, jnp.float32)

    def __call__(self, x):
        y, self.moving_mean, self.moving_var = batch_norm_pallas(
            x, self.gamma, self.beta, self.moving_mean, self.moving_var)
        return y


# --------------------------------------------------------------------------
# Pure-JAX reference (the torch training branch)
# --------------------------------------------------------------------------

def _batch_norm_ref(x, gamma, beta, mm, mv):
    if x.ndim == 2:
        mean = x.mean(axis=0)
        var = ((x - mean) ** 2).mean(axis=0)
    else:
        mean = x.mean(axis=(0, 2, 3), keepdims=True)
        var = ((x - mean) ** 2).mean(axis=(0, 2, 3), keepdims=True)
    x_hat = (x - mean) / jnp.sqrt(var + EPS)
    y = gamma * x_hat + beta
    new_mm = MOMENTUM * mm + (1.0 - MOMENTUM) * mean.reshape(mm.shape)
    new_mv = MOMENTUM * mv + (1.0 - MOMENTUM) * var.reshape(mv.shape)
    return y, new_mm, new_mv


if __name__ == "__main__":
    key = jax.random.PRNGKey(0)

    # 4-D (conv) path
    x = jax.random.normal(key, (2, 4, 16, 16), dtype=jnp.float32)
    bn = BatchNorm(num_features=4, num_dims=4)
    y = jax.block_until_ready(bn(x))
    mm = jax.block_until_ready(bn.moving_mean)
    mv = jax.block_until_ready(bn.moving_var)

    y_ref, mm_ref, mv_ref = _batch_norm_ref(
        x, jnp.ones((1, 4, 1, 1)), jnp.zeros((1, 4, 1, 1)),
        jnp.zeros((1, 4, 1, 1)), jnp.ones((1, 4, 1, 1)))
    assert jnp.allclose(y, y_ref, atol=1e-5, rtol=1e-5)
    assert jnp.allclose(mm, mm_ref, atol=1e-6)
    assert jnp.allclose(mv, mv_ref, atol=1e-6)

    # 2-D (fully connected) path
    x2d = jax.random.normal(jax.random.PRNGKey(1), (16, 32), dtype=jnp.float32)
    bn2 = BatchNorm(num_features=32, num_dims=2)
    y2 = jax.block_until_ready(bn2(x2d))
    y2_ref, mm2_ref, mv2_ref = _batch_norm_ref(
        x2d, jnp.ones((1, 32)), jnp.zeros((1, 32)),
        jnp.zeros((1, 32)), jnp.ones((1, 32)))
    assert jnp.allclose(y2, y2_ref, atol=1e-5, rtol=1e-5)
    assert jnp.allclose(jax.block_until_ready(bn2.moving_mean), mm2_ref, atol=1e-6)
    assert jnp.allclose(jax.block_until_ready(bn2.moving_var), mv2_ref, atol=1e-6)

    print("KERNEL_OK")
</pallas_src>

<mosaic_0001>
module attributes {stable_mosaic.version = 11 : i64} {
  func.func @_stats_kernel(%arg0: i32, %arg1: i32, %arg2: i32, %arg3: memref<1x4x256xf32, #tpu.memory_space<vmem>>, %arg4: memref<4x1xf32, #tpu.memory_space<vmem>>, %arg5: memref<4x1xf32, #tpu.memory_space<vmem>>, %arg6: memref<4x1xf32, #tpu.memory_space<vmem>>, %arg7: memref<4x1xf32, #tpu.memory_space<vmem>>, %arg8: memref<4x1xf32, #tpu.memory_space<vmem>>, %arg9: memref<4x1xf32, #tpu.memory_space<vmem>>, %arg10: memref<4x1xf32, #tpu.memory_space<vmem>>, %arg11: memref<4x1xf32, #tpu.memory_space<vmem>>, %arg12: memref<4x1xf32, #tpu.memory_space<vmem>>, %arg13: memref<4x1xf32, #tpu.memory_space<vmem>>) attributes {dimension_semantics = [#tpu.dimension_semantics<parallel>, #tpu.dimension_semantics<arbitrary>, #tpu.dimension_semantics<arbitrary>], iteration_bounds = array<i64: 1, 2, 1>, scalar_prefetch = 0 : i64, scratch_operands = 2 : i64, tpu.core_type = #tpu.core_type<tc>, window_params = [{transform_indices = @transform_0, window_bounds = array<i64: 1, 4, 256>}, {transform_indices = @transform_1, window_bounds = array<i64: 4, 1>}, {transform_indices = @transform_2, window_bounds = array<i64: 4, 1>}, {transform_indices = @transform_3, window_bounds = array<i64: 4, 1>}, {transform_indices = @transform_4, window_bounds = array<i64: 4, 1>}, {transform_indices = @transform_5, window_bounds = array<i64: 4, 1>}, {transform_indices = @transform_6, window_bounds = array<i64: 4, 1>}, {transform_indices = @transform_7, window_bounds = array<i64: 4, 1>}, {transform_indices = @transform_8, window_bounds = array<i64: 4, 1>}]} {
    %c0_i32 = arith.constant 0 : i32
    %0 = arith.cmpi eq, %arg1, %c0_i32 : i32
    %c1_i32 = arith.constant 1 : i32
    %1 = arith.cmpi eq, %arg1, %c1_i32 : i32
    %c0_i32_0 = arith.constant 0 : i32
    %2 = arith.cmpi eq, %arg2, %c0_i32_0 : i32
    %3 = arith.andi %0, %2 : i1
    %c0_i32_1 = arith.constant 0 : i32
    %4 = arith.cmpi eq, %arg2, %c0_i32_1 : i32
    %5 = arith.andi %1, %4 : i1
    %6 = arith.extui %3 : i1 to i32
    %c0_i32_2 = arith.constant 0 : i32
    %7 = arith.cmpi ne, %6, %c0_i32_2 : i32
    scf.if %7 {
      %cst_15 = arith.constant 0.000000e+00 : f32
      %23 = vector.broadcast %cst_15 : f32 to vector<4x1xf32>
      %c0_16 = arith.constant 0 : index
      %c0_17 = arith.constant 0 : index
      %24 = vector.load %arg12[%c0_16, %c0_17] : memref<4x1xf32, #tpu.memory_space<vmem>>, vector<4x1xf32>
      tpu.vector_store %arg12[%c0_16, %c0_17], %23 {strides = array<i32>} : memref<4x1xf32, #tpu.memory_space<vmem>>, vector<4x1xf32>,
      %cst_18 = arith.constant 0.000000e+00 : f32
      %25 = vector.broadcast %cst_18 : f32 to vector<4x1xf32>
      %c0_19 = arith.constant 0 : index
      %c0_20 = arith.constant 0 : index
      %26 = vector.load %arg13[%c0_19, %c0_20] : memref<4x1xf32, #tpu.memory_space<vmem>>, vector<4x1xf32>
      tpu.vector_store %arg13[%c0_19, %c0_20], %25 {strides = array<i32>} : memref<4x1xf32, #tpu.memory_space<vmem>>, vector<4x1xf32>,
    } else {
    }
    %c0 = arith.constant 0 : index
    %c0_3 = arith.constant 0 : index
    %c0_4 = arith.constant 0 : index
    %8 = vector.load %arg3[%c0, %c0_3, %c0_4] : memref<1x4x256xf32, #tpu.memory_space<vmem>>, vector<1x4x256xf32>
    %9 = vector.shape_cast %8 : vector<1x4x256xf32> to vector<4x256xf32>
    %c0_5 = arith.constant 0 : index
    %c0_6 = arith.constant 0 : index
    %10 = vector.load %arg12[%c0_5, %c0_6] : memref<4x1xf32, #tpu.memory_space<vmem>>, vector<4x1xf32>
    %cst = arith.constant dense<0.000000e+00> : vector<4xf32>
    %11 = vector.multi_reduction <add>, %9, %cst [1] : vector<4x256xf32> to vector<4xf32>
    %12 = vector.shape_cast %11 : vector<4xf32> to vector<4x1xf32>
    %13 = arith.addf %10, %12 : vector<4x1xf32>
    %c0_7 = arith.constant 0 : index
    %c0_8 = arith.constant 0 : index
    %14 = vector.load %arg12[%c0_7, %c0_8] : memref<4x1xf32, #tpu.memory_space<vmem>>, vector<4x1xf32>
    tpu.vector_store %arg12[%c0_7, %c0_8], %13 {strides = array<i32>} : memref<4x1xf32, #tpu.memory_space<vmem>>, vector<4x1xf32>,
    %c0_9 = arith.constant 0 : index
    %c0_10 = arith.constant 0 : index
    %15 = vector.load %arg13[%c0_9, %c0_10] : memref<4x1xf32, #tpu.memory_space<vmem>>, vector<4x1xf32>
    %16 = arith.mulf %9, %9 : vector<4x256xf32>
    %cst_11 = arith.constant dense<0.000000e+00> : vector<4xf32>
    %17 = vector.multi_reduction <add>, %16, %cst_11 [1] : vector<4x256xf32> to vector<4xf32>
    %18 = vector.shape_cast %17 : vector<4xf32> to vector<4x1xf32>
    %19 = arith.addf %15, %18 : vector<4x1xf32>
    %c0_12 = arith.constant 0 : index
    %c0_13 = arith.constant 0 : index
    %20 = vector.load %arg13[%c0_12, %c0_13] : memref<4x1xf32, #tpu.memory_space<vmem>>, vector<4x1xf32>
    tpu.vector_store %arg13[%c0_12, %c0_13], %19 {strides = array<i32>} : memref<4x1xf32, #tpu.memory_space<vmem>>, vector<4x1xf32>,
    %21 = arith.extui %5 : i1 to i32
    %c0_i32_14 = arith.constant 0 : i32
    %22 = arith.cmpi ne, %21, %c0_i32_14 : i32
    scf.if %22 {
      %c0_15 = arith.constant 0 : index
      %c0_16 = arith.constant 0 : index
      %23 = vector.load %arg12[%c0_15, %c0_16] : memref<4x1xf32, #tpu.memory_space<vmem>>, vector<4x1xf32>
      %cst_17 = arith.constant 0.001953125 : f32
      %24 = vector.broadcast %cst_17 : f32 to vector<4x1xf32>
      %25 = arith.mulf %23, %24 : vector<4x1xf32>
      %c0_18 = arith.constant 0 : index
      %c0_19 = arith.constant 0 : index
      %26 = vector.load %arg13[%c0_18, %c0_19] : memref<4x1xf32, #tpu.memory_space<vmem>>, vector<4x1xf32>
      %cst_20 = arith.constant 0.001953125 : f32
      %27 = vector.broadcast %cst_20 : f32 to vector<4x1xf32>
      %28 = arith.mulf %26, %27 : vector<4x1xf32>
      %29 = arith.mulf %25, %25 : vector<4x1xf32>
      %30 = arith.subf %28, %29 : vector<4x1xf32>
      %cst_21 = arith.constant 0.000000e+00 : f32
      %31 = vector.broadcast %cst_21 : f32 to vector<4x1xf32>
      %32 = arith.maximumf %30, %31 : vector<4x1xf32>
      %cst_22 = arith.constant 9.99999974E-6 : f32
      %33 = vector.broadcast %cst_22 : f32 to vector<4x1xf32>
      %34 = arith.addf %32, %33 : vector<4x1xf32>
      %35 = math.rsqrt %34 : vector<4x1xf32>
      %c0_23 = arith.constant 0 : index
      %c0_24 = arith.constant 0 : index
      %36 = vector.load %arg4[%c0_23, %c0_24] : memref<4x1xf32, #tpu.memory_space<vmem>>, vector<4x1xf32>
      %37 = arith.mulf %36, %35 : vector<4x1xf32>
      %c0_25 = arith.constant 0 : index
      %c0_26 = arith.constant 0 : index
      %38 = vector.load %arg8[%c0_25, %c0_26] : memref<4x1xf32, #tpu.memory_space<vmem>>, vector<4x1xf32>
      tpu.vector_store %arg8[%c0_25, %c0_26], %37 {strides = array<i32>} : memref<4x1xf32, #tpu.memory_space<vmem>>, vector<4x1xf32>,
      %c0_27 = arith.constant 0 : index
      %c0_28 = arith.constant 0 : index
      %39 = vector.load %arg5[%c0_27, %c0_28] : memref<4x1xf32, #tpu.memory_space<vmem>>, vector<4x1xf32>
      %40 = arith.mulf %25, %37 : vector<4x1xf32>
      %41 = arith.subf %39, %40 : vector<4x1xf32>
      %c0_29 = arith.constant 0 : index
      %c0_30 = arith.constant 0 : index
      %42 = vector.load %arg9[%c0_29, %c0_30] : memref<4x1xf32, #tpu.memory_space<vmem>>, vector<4x1xf32>
      tpu.vector_store %arg9[%c0_29, %c0_30], %41 {strides = array<i32>} : memref<4x1xf32, #tpu.memory_space<vmem>>, vector<4x1xf32>,
      %c0_31 = arith.constant 0 : index
      %c0_32 = arith.constant 0 : index
      %43 = vector.load %arg6[%c0_31, %c0_32] : memref<4x1xf32, #tpu.memory_space<vmem>>, vector<4x1xf32>
      %cst_33 = arith.constant 0.899999976 : f32
      %44 = vector.broadcast %cst_33 : f32 to vector<4x1xf32>
      %45 = arith.mulf %44, %43 : vector<4x1xf32>
      %cst_34 = arith.constant 1.000000e-01 : f32
      %46 = vector.broadcast %cst_34 : f32 to vector<4x1xf32>
      %47 = arith.mulf %46, %25 : vector<4x1xf32>
      %48 = arith.addf %45, %47 : vector<4x1xf32>
      %c0_35 = arith.constant 0 : index
      %c0_36 = arith.constant 0 : index
      %49 = vector.load %arg10[%c0_35, %c0_36] : memref<4x1xf32, #tpu.memory_space<vmem>>, vector<4x1xf32>
      tpu.vector_store %arg10[%c0_35, %c0_36], %48 {strides = array<i32>} : memref<4x1xf32, #tpu.memory_space<vmem>>, vector<4x1xf32>,
      %c0_37 = arith.constant 0 : index
      %c0_38 = arith.constant 0 : index
      %50 = vector.load %arg7[%c0_37, %c0_38] : memref<4x1xf32, #tpu.memory_space<vmem>>, vector<4x1xf32>
      %cst_39 = arith.constant 0.899999976 : f32
      %51 = vector.broadcast %cst_39 : f32 to vector<4x1xf32>
      %52 = arith.mulf %51, %50 : vector<4x1xf32>
      %cst_40 = arith.constant 1.000000e-01 : f32
      %53 = vector.broadcast %cst_40 : f32 to vector<4x1xf32>
      %54 = arith.mulf %53, %32 : vector<4x1xf32>
      %55 = arith.addf %52, %54 : vector<4x1xf32>
      %c0_41 = arith.constant 0 : index
      %c0_42 = arith.constant 0 : index
      %56 = vector.load %arg11[%c0_41, %c0_42] : memref<4x1xf32, #tpu.memory_space<vmem>>, vector<4x1xf32>
      tpu.vector_store %arg11[%c0_41, %c0_42], %55 {strides = array<i32>} : memref<4x1xf32, #tpu.memory_space<vmem>>, vector<4x1xf32>,
    } else {
    }
    return
  }
  func.func @transform_0(%arg0: i32, %arg1: i32, %arg2: i32) -> (i32, i32, i32) {
    %c0_i32 = arith.constant 0 : i32
    return %arg1, %arg0, %arg2 : i32, i32, i32
  }
  func.func @transform_1(%arg0: i32, %arg1: i32, %arg2: i32) -> (i32, i32) {
    %c0_i32 = arith.constant 0 : i32
    %c0_i32_0 = arith.constant 0 : i32
    return %arg0, %c0_i32 : i32, i32
  }
  func.func @transform_2(%arg0: i32, %arg1: i32, %arg2: i32) -> (i32, i32) {
    %c0_i32 = arith.constant 0 : i32
    %c0_i32_0 = arith.constant 0 : i32
    return %arg0, %c0_i32 : i32, i32
  }
  func.func @transform_3(%arg0: i32, %arg1: i32, %arg2: i32) -> (i32, i32) {
    %c0_i32 = arith.constant 0 : i32
    %c0_i32_0 = arith.constant 0 : i32
    return %arg0, %c0_i32 : i32, i32
  }
  func.func @transform_4(%arg0: i32, %arg1: i32, %arg2: i32) -> (i32, i32) {
    %c0_i32 = arith.constant 0 : i32
    %c0_i32_0 = arith.constant 0 : i32
    return %arg0, %c0_i32 : i32, i32
  }
  func.func @transform_5(%arg0: i32, %arg1: i32, %arg2: i32) -> (i32, i32) {
    %c0_i32 = arith.constant 0 : i32
    %c0_i32_0 = arith.constant 0 : i32
    return %arg0, %c0_i32 : i32, i32
  }
  func.func @transform_6(%arg0: i32, %arg1: i32, %arg2: i32) -> (i32, i32) {
    %c0_i32 = arith.constant 0 : i32
    %c0_i32_0 = arith.constant 0 : i32
    return %arg0, %c0_i32 : i32, i32
  }
  func.func @transform_7(%arg0: i32, %arg1: i32, %arg2: i32) -> (i32, i32) {
    %c0_i32 = arith.constant 0 : i32
    %c0_i32_0 = arith.constant 0 : i32
    return %arg0, %c0_i32 : i32, i32
  }
  func.func @transform_8(%arg0: i32, %arg1: i32, %arg2: i32) -> (i32, i32) {
    %c0_i32 = arith.constant 0 : i32
    %c0_i32_0 = arith.constant 0 : i32
    return %arg0, %c0_i32 : i32, i32
  }
}

</mosaic_0001>

<bundles_post_ra>
// kernel: tpu_custom_call.1
= control target key start
LH: loop header
LB: loop body
LE: loop exit
PB: predicated region body
PF: predicated region fallthrough
CT: control target
= control target key end

     0   :  { %s855_s27 = smov 0   ;;  %s857_s28 = smov 0   ;;  %s923_s0 = inlined_call_operand.vmem [shape: f32[2,4,256], index: 0, kind: input, shape index: {}]   ;;  %s924_s1 = inlined_call_operand.vmem [shape: f32[4,1], index: 1, kind: input, shape index: {}]   ;;  %s925_s2 = inlined_call_operand.vmem [shape: f32[4,1], index: 2, kind: input, shape index: {}]   ;;  %s926_s3 = inlined_call_operand.vmem [shape: f32[4,1], index: 3, kind: input, shape index: {}]   ;;  %s927_s4 = inlined_call_operand.vmem [shape: f32[4,1], index: 4, kind: input, shape index: {}]   ;;  %s928_s5 = inlined_call_operand.vmem [shape: f32[4,1], index: 5, kind: output, shape index: {0}]   ;;  %s929_s6 = inlined_call_operand.vmem [shape: f32[4,1], index: 6, kind: output, shape index: {1}]   ;;  %s930_s7 = inlined_call_operand.vmem [shape: f32[4,1], index: 7, kind: output, shape index: {2}]   ;;  %s931_s8 = inlined_call_operand.vmem [shape: f32[4,1], index: 8, kind: output, shape index: {3}]  }
   0x1   :  { %s859_s29 = smov 0  }
   0x2 LB: > { %s34_s30 = sadd.s32 1, %s803_s28  ;;  %p743_p0 = scmp.ge.s32.totalorder %s807_s29, 1  ;;  %s807_s29 = sphi %s859_s29, %s19_s29   ;;  %s803_s28 = sphi %s857_s28, %s933_s28   ;;  %s799_s27 = sphi %s855_s27, %s932_s27  }
   0x3   : > { %p36_p1 = scmp.ge.s32.totalorder %s34_s30, 2  ;;  %p337_p2 = scmp.lt.s32.totalorder %s807_s29, 3 }
   0x5   : > { %s935_s30 = smov (%p36_p1, %s34_s30), 0  ;;  %p338_p3 = pnand %p743_p0, %p337_p2 }
   0x6   : > { %p407_p4 = scmp.lt.s32.totalorder (!%p338_p3), %s799_s27, 1  ;;  %p452_p5 = scmp.eq.s32.totalorder (!%p338_p3), %s799_s27, 0 }
   0x7   : > { %341 = sbr.rel (%p338_p3) target bundleno = 205 (0xcd), region = 40  ;;  %p453_p6 = scmp.eq.s32.totalorder (!%p338_p3), %s799_s27, 1 }
   0xc   : > { %s408_s9 = scalar_select %p407_p4, %s799_s27, 1  ;;  %vm461_vm0 = vcmask (%p452_p5), 3072   ;;  %v809_v0 = vmov (%p452_p5), 0.0  }
   0xd   : > { %460 = sbr.rel (!%p452_p5) target bundleno = 18 (0x12), region = 44  ;;  %462 = vst.msk [vmem:[#allocation2] sm:$0xf] (%p452_p5), %vm461_vm0, %v809_v0  ;;  %463 = vst.msk [vmem:[#allocation3] sm:$0xf] (%p452_p5), %vm461_vm0, %v809_v0 }
   0xe   : > { %s754_s10 = sshll.u32 %s408_s9, 3 }
   0xf   : > { %s418_s13 = scalar_lea.vmem %s923_s0, %s754_s10 }
  0x12 PF: > { %v464_v1 = vld [vmem:[%s418_s13] sm:$0xff]  ;;  %vm469_vm1 = vcmask 1043456   ;;  %vm476_vm2 = vcmask 3072  }
  0x13   : > { %v467_v2 = vcombine.high %v464_v1, %v464_v1  ;;  %v470_v3 = vsel %vm469_vm1, %v464_v1, 0.0  ;;  %v479_v4 = vmul.f32 %v464_v1, %v464_v1  ;;  %v508_v21 = vld [vmem:[%s926_s3] sm:$0xf] (%p453_p6) }
  0x14   : > { %v465_v11 = vld [vmem:[#allocation2] sm:$0xf]  ;;  %v478_v14 = vld [vmem:[#allocation3] sm:$0xf]  ;;  %v509_v22 = vmul.f32 (%p453_p6), 0.9, %v508_v21 }
  0x15   : > { %v471_v5 = vsel %vm469_vm1, %v467_v2, 0.0  ;;  %v481_v6 = vcombine.high %v479_v4, %v479_v4  ;;  %v483_v7 = vsel %vm469_vm1, %v479_v4, 0.0  ;;  %v513_v25 = vld [vmem:[%s927_s4] sm:$0xf] (%p453_p6) }
  0x16   : > { %v472_v8 = vadd.f32 %v471_v5, %v470_v3  ;;  %v514_v29 = vmul.f32 (%p453_p6), 0.9, %v513_v25  ;;  %v501_v33 = vld [vmem:[%s924_s1] sm:$0xf] (%p453_p6) }
  0x17   : > { %v484_v9 = vsel %vm469_vm1, %v481_v6, 0.0  ;;  %v504_v36 = vld [vmem:[%s925_s2] sm:$0xf] (%p453_p6) }
  0x18   : > { %473 = vadd.xlane.f32.xlu0 %v472_v8  ;;  %v485_v10 = vadd.f32 %v484_v9, %v483_v7 }
  0x1c   : > { %486 = vadd.xlane.f32.xlu0 %v485_v10 }
  0xa1   : > { %v474_v12 = vpop.xlane.xlu0 %473 }
  0xa2   : > { %v475_v13 = vadd.f32 %v474_v12, %v465_v11 }
  0xa4   : > { %477 = vst.msk [vmem:[#allocation2] sm:$0xf] %vm476_vm2, %v475_v13  ;;  %491 = sbr.rel (!%p453_p6) target bundleno = 205 (0xcd), region = 48 }
  0xa5   : > { %v487_v15 = vpop.xlane.xlu0 %486 }
  0xa6   : > { %v488_v16 = vadd.f32 %v487_v15, %v478_v14 }
  0xa8   : > { %489 = vst.msk [vmem:[#allocation3] sm:$0xf] %vm476_vm2, %v488_v16 }
  0xab   : > { %v492_v17 = vld [vmem:[#allocation2] sm:$0xf] }
  0xac   : > { %v493_v19 = vmul.f32 0.001953125, %v492_v17 }
  0xae   : > { %v496_v23 = vmul.f32 %v493_v19, %v493_v19  ;;  %v510_v24 = vmul.f32 0.1, %v493_v19 }
  0xaf   : > { %v494_v18 = vld [vmem:[#allocation3] sm:$0xf] }
  0xb0   : > { %v495_v20 = vmul.f32 0.001953125, %v494_v18  ;;  %v511_v27 = vadd.f32 %v510_v24, %v509_v22 }
  0xb2   : > { %v497_v26 = vsub.f32 %v495_v20, %v496_v23  ;;  %512 = vst.msk [vmem:[%s930_s7] sm:$0xf] %vm476_vm2, %v511_v27 }
  0xb4   : > { %v498_v28 = vmax.f32 %v497_v26, 0.0 }
  0xb6   : > { %v499_v30 = vadd.f32 1e-05, %v498_v28  ;;  %v515_v31 = vmul.f32 0.1, %v498_v28 }
  0xb8   : > { %783 = vrsqrt.f32 %v499_v30  ;;  %v516_v32 = vadd.f32 %v515_v31, %v514_v29 }
  0xba   : > { %517 = vst.msk [vmem:[%s931_s8] sm:$0xf] %vm476_vm2, %v516_v32 }
  0xc5   : > { %v784_v34 = vpop.eup %783 }
  0xc6   : > { %v502_v35 = vmul.f32 %v784_v34, %v501_v33 }
  0xc8   : > { %503 = vst.msk [vmem:[%s928_s5] sm:$0xf] %vm476_vm2, %v502_v35  ;;  %v505_v37 = vmul.f32 %v502_v35, %v493_v19 }
  0xca   : > { %v506_v38 = vsub.f32 %v504_v36, %v505_v37 }
  0xcc   : > { %507 = vst.msk [vmem:[%s929_s6] sm:$0xf] %vm476_vm2, %v506_v38 }
  0xcd PF: > { %s19_s29 = sadd.s32 1, %s807_s29   ;;  %s932_s27 = smov %s803_s28 }
  0xce   : > { %p16_p7 = scmp.ge.s32.totalorder %s19_s29, 4   ;;  %s933_s28 = smov %s935_s30 }
  0xd0   :  { %18 = sbr.rel (!%p16_p7) target bundleno = 2 (0x2), region = 126 }

</bundles_post_ra>
